<compile_context>
chip_gen: v6e
topology: v6e:2x2x1
jax: 0.10.0
libtpu: 0.0.40
codegen_flags: <defaults>
</compile_context>

<pallas_src>
import jax
import jax.numpy as jnp
from jax.experimental import pallas as pl
from jax.experimental.pallas import tpu as pltpu


H = W = 220          # spatial size implied by fc: (220 // 5) == 44
POOL = 5
PH = PW = H // POOL  # 44
FEAT = PH * PW       # 1936
HID = 44
OUT = 9
HID_PAD = 128        # lane-dense hidden width (zero-padded)
OUT_PAD = 128        # lane-dense output width (zero-padded, sliced to 9 outside)
MAX_TB = 1024        # batch tile: 2 x (1024*1936*4)B ~= 15.8 MiB double-buffered
                     # input + ~2.3 MiB weights/biases + ~0.5 MiB output
                     # -> ~20 MiB, safe on v5e/v6e/v7x with a 32 MiB limit.


def _round_up(n, m):
    return ((n + m - 1) // m) * m


def _fc_kernel(p_ref, w1_ref, b1_ref, w2_ref, b2_ref, o_ref):
    # p_ref: (TB, 1936) pooled activations, lane-dense.
    h = jnp.dot(p_ref[...], w1_ref[...],
                preferred_element_type=jnp.float32) + b1_ref[...]    # (TB, 128)
    h = jnp.maximum(h, 0.0)                                          # ReLU
    o = jnp.dot(h, w2_ref[...],
                preferred_element_type=jnp.float32) + b2_ref[...]    # (TB, 128)
    o_ref[...] = o.astype(o_ref.dtype)                               # full-lane store


def prepare_params(w1, b1, w2, b2):
    """Zero-pad weights/biases to lane-dense widths.  Call ONCE (hoisted out of
    the per-call forward path per review).  Weights are stored transposed vs.
    torch.nn.Linear: w1 (1936, 44), w2 (44, 9)."""
    w1p = jnp.zeros((FEAT, HID_PAD), jnp.float32).at[:, :HID].set(w1)
    b1p = jnp.zeros((1, HID_PAD), jnp.float32).at[0, :HID].set(b1)
    w2p = jnp.zeros((HID_PAD, OUT_PAD), jnp.float32).at[:HID, :OUT].set(w2)
    b2p = jnp.zeros((1, OUT_PAD), jnp.float32).at[0, :OUT].set(b2)
    return w1p, b1p, w2p, b2p


@jax.jit
def track_agile_extractor(x, w1p, b1p, w2p, b2p):
    """x: (B, 1, 220, 220) float32 NCHW; params pre-padded via prepare_params.
    Returns (B, 9) float32."""
    B = x.shape[0]
    assert x.shape[1:] == (1, H, W), x.shape

    tb = min(MAX_TB, _round_up(B, 8))
    b_pad = _round_up(B, tb)

    # 5x5 / stride-5 MIN pool (== -maxpool(-x)) + flatten, as one fused XLA
    # reduction: x is read exactly once; only (B, 1936) is materialized.
    # Flatten order 44*h + w matches PyTorch's .view(B, -1).
    pooled = jnp.min(
        x.astype(jnp.float32).reshape(B, PH, POOL, PW, POOL), axis=(2, 4)
    ).reshape(B, FEAT)
    if b_pad != B:
        pooled = jnp.pad(pooled, ((0, b_pad - B), (0, 0)))

    cost = pl.CostEstimate(
        flops=2 * b_pad * (FEAT * HID_PAD + HID_PAD * OUT_PAD),
        transcendentals=0,
        bytes_accessed=4 * (b_pad * FEAT + FEAT * HID_PAD + HID_PAD
                            + HID_PAD * OUT_PAD + OUT_PAD + b_pad * OUT_PAD),
    )

    out = pl.pallas_call(
        _fc_kernel,
        out_shape=jax.ShapeDtypeStruct((b_pad, OUT_PAD), jnp.float32),
        grid=(b_pad // tb,),
        in_specs=[
            # pooled activations: tiled over batch, FEAT whole on lanes.
            pl.BlockSpec((tb, FEAT), lambda i: (i, 0)),
            # weights / biases: resident (constant block index, never re-DMA'd).
            pl.BlockSpec((FEAT, HID_PAD), lambda i: (0, 0)),
            pl.BlockSpec((1, HID_PAD), lambda i: (0, 0)),
            pl.BlockSpec((HID_PAD, OUT_PAD), lambda i: (0, 0)),
            pl.BlockSpec((1, OUT_PAD), lambda i: (0, 0)),
        ],
        out_specs=pl.BlockSpec((tb, OUT_PAD), lambda i: (i, 0)),
        compiler_params=pltpu.CompilerParams(
            dimension_semantics=("parallel",),     # 2 TCs on v7x; no-op v5e/v6e
            vmem_limit_bytes=32 * 1024 * 1024,     # lifts v5e's 16 MiB default
        ),
        cost_estimate=cost,
    )(pooled, w1p, b1p, w2p, b2p)

    return out[:B, :OUT]


def init_params(key):
    """Deterministic Kaiming-normal (fan_in, relu) init, zero biases.
    Weights are stored transposed vs. torch.nn.Linear: (in, out)."""
    k1, k2 = jax.random.split(key)
    std1 = (2.0 / FEAT) ** 0.5
    std2 = (2.0 / HID) ** 0.5
    w1 = jax.random.normal(k1, (FEAT, HID), jnp.float32) * std1
    b1 = jnp.zeros((HID,), jnp.float32)
    w2 = jax.random.normal(k2, (HID, OUT), jnp.float32) * std2
    b2 = jnp.zeros((OUT,), jnp.float32)
    return w1, b1, w2, b2


def reference_forward(x, w1, b1, w2, b2):
    """Pure-JAX reference mirroring the PyTorch module."""
    B = x.shape[0]
    xs = x.reshape(B, PH, POOL, PW, POOL)
    pooled = -jnp.max(-xs, axis=(2, 4))          # -maxpool(-x) == minpool
    flat = pooled.reshape(B, FEAT)
    h = jnp.maximum(flat @ w1 + b1, 0.0)
    return h @ w2 + b2


if __name__ == "__main__":
    key = jax.random.PRNGKey(0)
    kx, kp = jax.random.split(key)

    B = 6                                    # small batch (padded to 8 inside)
    x = jax.random.normal(kx, (B, 1, H, W), jnp.float32)   # NCHW
    w1, b1, w2, b2 = init_params(kp)
    w1p, b1p, w2p, b2p = prepare_params(w1, b1, w2, b2)    # once, outside hot path

    out = track_agile_extractor(x, w1p, b1p, w2p, b2p)
    out = jax.block_until_ready(out)

    ref = reference_forward(x, w1, b1, w2, b2)
    assert out.shape == (B, OUT), out.shape
    assert jnp.allclose(out, ref, atol=1e-4, rtol=1e-4), (
        f"max abs err = {jnp.max(jnp.abs(out - ref))}")

    print("KERNEL_OK")
</pallas_src>

<mosaic_0001>
module attributes {stable_mosaic.version = 11 : i64} {
  func.func @_fc_kernel(%arg0: i32, %arg1: memref<8x1936xf32, #tpu.memory_space<vmem>>, %arg2: memref<1936x128xf32, #tpu.memory_space<vmem>>, %arg3: memref<1x128xf32, #tpu.memory_space<vmem>>, %arg4: memref<128x128xf32, #tpu.memory_space<vmem>>, %arg5: memref<1x128xf32, #tpu.memory_space<vmem>>, %arg6: memref<8x128xf32, #tpu.memory_space<vmem>>) attributes {dimension_semantics = [#tpu.dimension_semantics<parallel>], iteration_bounds = array<i64: 1>, scalar_prefetch = 0 : i64, scratch_operands = 0 : i64, tpu.core_type = #tpu.core_type<tc>, window_params = [{transform_indices = @transform_0, window_bounds = array<i64: 8, 1936>}, {pipeline_mode = #tpu.pipeline_mode<synchronous>, transform_indices = @transform_1, window_bounds = array<i64: 1936, 128>}, {pipeline_mode = #tpu.pipeline_mode<synchronous>, transform_indices = @transform_2, window_bounds = array<i64: 1, 128>}, {pipeline_mode = #tpu.pipeline_mode<synchronous>, transform_indices = @transform_3, window_bounds = array<i64: 128, 128>}, {pipeline_mode = #tpu.pipeline_mode<synchronous>, transform_indices = @transform_4, window_bounds = array<i64: 1, 128>}, {transform_indices = @transform_5, window_bounds = array<i64: 8, 128>}]} {
    %c0 = arith.constant 0 : index
    %c0_0 = arith.constant 0 : index
    %0 = vector.load %arg1[%c0, %c0_0] : memref<8x1936xf32, #tpu.memory_space<vmem>>, vector<8x1936xf32>
    %c0_1 = arith.constant 0 : index
    %c0_2 = arith.constant 0 : index
    %1 = vector.load %arg2[%c0_1, %c0_2] : memref<1936x128xf32, #tpu.memory_space<vmem>>, vector<1936x128xf32>
    %cst = arith.constant dense<0.000000e+00> : vector<8x128xf32>
    %2 = tpu.matmul %0, %1, %cst {dimension_numbers = #tpu.dot_dimension_numbers<[1], [0], [0], [1], [0, 0, 1, 1], [], []>} : vector<8x1936xf32>, vector<1936x128xf32>, vector<8x128xf32> -> vector<8x128xf32>
    %c0_3 = arith.constant 0 : index
    %c0_4 = arith.constant 0 : index
    %3 = vector.load %arg3[%c0_3, %c0_4] : memref<1x128xf32, #tpu.memory_space<vmem>>, vector<1x128xf32>
    %4 = vector.broadcast %3 : vector<1x128xf32> to vector<8x128xf32>
    %5 = arith.addf %2, %4 : vector<8x128xf32>
    %cst_5 = arith.constant 0.000000e+00 : f32
    %6 = vector.broadcast %cst_5 : f32 to vector<8x128xf32>
    %7 = arith.maximumf %5, %6 : vector<8x128xf32>
    %c0_6 = arith.constant 0 : index
    %c0_7 = arith.constant 0 : index
    %8 = vector.load %arg4[%c0_6, %c0_7] : memref<128x128xf32, #tpu.memory_space<vmem>>, vector<128x128xf32>
    %cst_8 = arith.constant dense<0.000000e+00> : vector<8x128xf32>
    %9 = tpu.matmul %7, %8, %cst_8 {dimension_numbers = #tpu.dot_dimension_numbers<[1], [0], [0], [1], [0, 0, 1, 1], [], []>} : vector<8x128xf32>, vector<128x128xf32>, vector<8x128xf32> -> vector<8x128xf32>
    %c0_9 = arith.constant 0 : index
    %c0_10 = arith.constant 0 : index
    %10 = vector.load %arg5[%c0_9, %c0_10] : memref<1x128xf32, #tpu.memory_space<vmem>>, vector<1x128xf32>
    %11 = vector.broadcast %10 : vector<1x128xf32> to vector<8x128xf32>
    %12 = arith.addf %9, %11 : vector<8x128xf32>
    %c0_11 = arith.constant 0 : index
    %c0_12 = arith.constant 0 : index
    %13 = vector.load %arg6[%c0_11, %c0_12] : memref<8x128xf32, #tpu.memory_space<vmem>>, vector<8x128xf32>
    tpu.vector_store %arg6[%c0_11, %c0_12], %12 {strides = array<i32>} : memref<8x128xf32, #tpu.memory_space<vmem>>, vector<8x128xf32>,
    return
  }
  func.func @transform_0(%arg0: i32) -> (i32, i32) {
    %c0_i32 = arith.constant 0 : i32
    %c0_i32_0 = arith.constant 0 : i32
    return %arg0, %c0_i32 : i32, i32
  }
  func.func @transform_1(%arg0: i32) -> (i32, i32) {
    %c0_i32 = arith.constant 0 : i32
    %c0_i32_0 = arith.constant 0 : i32
    %c0_i32_1 = arith.constant 0 : i32
    return %c0_i32, %c0_i32_0 : i32, i32
  }
  func.func @transform_2(%arg0: i32) -> (i32, i32) {
    %c0_i32 = arith.constant 0 : i32
    %c0_i32_0 = arith.constant 0 : i32
    %c0_i32_1 = arith.constant 0 : i32
    return %c0_i32, %c0_i32_0 : i32, i32
  }
  func.func @transform_3(%arg0: i32) -> (i32, i32) {
    %c0_i32 = arith.constant 0 : i32
    %c0_i32_0 = arith.constant 0 : i32
    %c0_i32_1 = arith.constant 0 : i32
    return %c0_i32, %c0_i32_0 : i32, i32
  }
  func.func @transform_4(%arg0: i32) -> (i32, i32) {
    %c0_i32 = arith.constant 0 : i32
    %c0_i32_0 = arith.constant 0 : i32
    %c0_i32_1 = arith.constant 0 : i32
    return %c0_i32, %c0_i32_0 : i32, i32
  }
  func.func @transform_5(%arg0: i32) -> (i32, i32) {
    %c0_i32 = arith.constant 0 : i32
    %c0_i32_0 = arith.constant 0 : i32
    return %arg0, %c0_i32 : i32, i32
  }
}

</mosaic_0001>

<bundles_post_ra>
// kernel: track_agile_extractor.1
= control target key start
LH: loop header
LB: loop body
LE: loop exit
PB: predicated region body
PF: predicated region fallthrough
CT: control target
= control target key end

     0   :  { %s2183_s0 = inlined_call_operand.vmem [shape: f32[8,1936], index: 0, kind: input, shape index: {}]   ;;  %s2184_s1 = inlined_call_operand.vmem [shape: f32[1936,128], index: 1, kind: input, shape index: {}]   ;;  %s2185_s2 = inlined_call_operand.vmem [shape: f32[1,128], index: 2, kind: input, shape index: {}]   ;;  %s2186_s3 = inlined_call_operand.vmem [shape: f32[128,128], index: 3, kind: input, shape index: {}]   ;;  %s2187_s4 = inlined_call_operand.vmem [shape: f32[1,128], index: 4, kind: input, shape index: {}]   ;;  %s2188_s5 = inlined_call_operand.hbm [shape: f32[8,128], index: 5, kind: output, shape index: {}]  }
   0x1   :  { %v68_v0 = vld [vmem:[%s2184_s1 + $0xf8] sm:$0xff]  ;;  %v67_v4 = vld [vmem:[%s2184_s1 + $0xf0] sm:$0xff]  ;;  %v66_v8 = vld [vmem:[%s2184_s1 + $0xe8] sm:$0xff] }
   0x2   :  { %v100_v1 = vld [vmem:[%s2184_s1 + $0x1f8] sm:$0xff]  ;;  %962 = vmatprep.subr.mxu0 %v68_v0  ;;  %v99_v5 = vld [vmem:[%s2184_s1 + $0x1f0] sm:$0xff]  ;;  %v98_v9 = vld [vmem:[%s2184_s1 + $0x1e8] sm:$0xff] }
   0x3   :  { %v52_v2 = vld [vmem:[%s2184_s1 + $0x78] sm:$0xff]  ;;  %997 = vmatprep.subr.mxu1 %v100_v1  ;;  %v51_v6 = vld [vmem:[%s2184_s1 + $0x70] sm:$0xff]  ;;  %v50_v10 = vld [vmem:[%s2184_s1 + $0x68] sm:$0xff] }
   0x4   :  { %v84_v3 = vld [vmem:[%s2184_s1 + $0x178] sm:$0xff]  ;;  %963 = vmatpush3.msra.mxu0 %v52_v2  ;;  %v83_v7 = vld [vmem:[%s2184_s1 + $0x170] sm:$0xff]  ;;  %v82_v11 = vld [vmem:[%s2184_s1 + $0x168] sm:$0xff] }
   0x5   :  { %998 = vmatpush3.msra.mxu1 %v84_v3  ;;  %964 = vmatprep.subr.mxu0 %v67_v4  ;;  %v65_v12 = vld [vmem:[%s2184_s1 + $0xe0] sm:$0xff]  ;;  %v64_v16 = vld [vmem:[%s2184_s1 + $0xd8] sm:$0xff]  ;;  %v63_v20 = vld [vmem:[%s2184_s1 + $0xd0] sm:$0xff] }
   0x6   :  { %999 = vmatprep.subr.mxu1 %v99_v5  ;;  %965 = vmatpush3.msra.mxu0 %v51_v6  ;;  %v97_v13 = vld [vmem:[%s2184_s1 + $0x1e0] sm:$0xff]  ;;  %v96_v17 = vld [vmem:[%s2184_s1 + $0x1d8] sm:$0xff]  ;;  %v95_v21 = vld [vmem:[%s2184_s1 + $0x1d0] sm:$0xff] }
   0x7   :  { %1000 = vmatpush3.msra.mxu1 %v83_v7  ;;  %966 = vmatprep.subr.mxu0 %v66_v8  ;;  %v49_v14 = vld [vmem:[%s2184_s1 + $0x60] sm:$0xff]  ;;  %v48_v18 = vld [vmem:[%s2184_s1 + $0x58] sm:$0xff]  ;;  %v47_v22 = vld [vmem:[%s2184_s1 + $0x50] sm:$0xff] }
   0x8   :  { %1001 = vmatprep.subr.mxu1 %v98_v9  ;;  %v81_v15 = vld [vmem:[%s2184_s1 + $0x160] sm:$0xff]  ;;  %967 = vmatpush3.msra.mxu0 %v50_v10  ;;  %v80_v19 = vld [vmem:[%s2184_s1 + $0x158] sm:$0xff]  ;;  %v79_v23 = vld [vmem:[%s2184_s1 + $0x150] sm:$0xff] }
   0x9   :  { %1002 = vmatpush3.msra.mxu1 %v82_v11  ;;  %968 = vmatprep.subr.mxu0 %v65_v12  ;;  %v62_v24 = vld [vmem:[%s2184_s1 + $0xc8] sm:$0xff]  ;;  %v61_v28 = vld [vmem:[%s2184_s1 + $0xc0] sm:$0xff]  ;;  %v60_v32 = vld [vmem:[%s2184_s1 + $0xb8] sm:$0xff] }
   0xa   :  { %1003 = vmatprep.subr.mxu1 %v97_v13  ;;  %969 = vmatpush3.msra.mxu0 %v49_v14  ;;  %v94_v25 = vld [vmem:[%s2184_s1 + $0x1c8] sm:$0xff]  ;;  %v93_v29 = vld [vmem:[%s2184_s1 + $0x1c0] sm:$0xff]  ;;  %v92_v33 = vld [vmem:[%s2184_s1 + $0x1b8] sm:$0xff] }
   0xb   :  { %1004 = vmatpush3.msra.mxu1 %v81_v15  ;;  %970 = vmatprep.subr.mxu0 %v64_v16  ;;  %v46_v26 = vld [vmem:[%s2184_s1 + $0x48] sm:$0xff]  ;;  %v45_v30 = vld [vmem:[%s2184_s1 + $0x40] sm:$0xff]  ;;  %v44_v34 = vld [vmem:[%s2184_s1 + $0x38] sm:$0xff] }
   0xc   :  { %1005 = vmatprep.subr.mxu1 %v96_v17  ;;  %971 = vmatpush3.msra.mxu0 %v48_v18  ;;  %v78_v27 = vld [vmem:[%s2184_s1 + $0x148] sm:$0xff]  ;;  %v77_v31 = vld [vmem:[%s2184_s1 + $0x140] sm:$0xff]  ;;  %v76_v35 = vld [vmem:[%s2184_s1 + $0x138] sm:$0xff] }
   0xd   :  { %1006 = vmatpush3.msra.mxu1 %v80_v19  ;;  %972 = vmatprep.subr.mxu0 %v63_v20  ;;  %v59_v36 = vld [vmem:[%s2184_s1 + $0xb0] sm:$0xff]  ;;  %v58_v40 = vld [vmem:[%s2184_s1 + $0xa8] sm:$0xff]  ;;  %v57_v44 = vld [vmem:[%s2184_s1 + $0xa0] sm:$0xff] }
   0xe   :  { %1007 = vmatprep.subr.mxu1 %v95_v21  ;;  %973 = vmatpush3.msra.mxu0 %v47_v22  ;;  %v91_v37 = vld [vmem:[%s2184_s1 + $0x1b0] sm:$0xff]  ;;  %v90_v41 = vld [vmem:[%s2184_s1 + $0x1a8] sm:$0xff]  ;;  %v89_v45 = vld [vmem:[%s2184_s1 + $0x1a0] sm:$0xff] }
   0xf   :  { %1008 = vmatpush3.msra.mxu1 %v79_v23  ;;  %974 = vmatprep.subr.mxu0 %v62_v24  ;;  %v43_v38 = vld [vmem:[%s2184_s1 + $0x30] sm:$0xff]  ;;  %v42_v42 = vld [vmem:[%s2184_s1 + $0x28] sm:$0xff]  ;;  %v41_v46 = vld [vmem:[%s2184_s1 + $0x20] sm:$0xff] }
  0x10   :  { %1009 = vmatprep.subr.mxu1 %v94_v25  ;;  %975 = vmatpush3.msra.mxu0 %v46_v26  ;;  %v75_v39 = vld [vmem:[%s2184_s1 + $0x130] sm:$0xff]  ;;  %v74_v43 = vld [vmem:[%s2184_s1 + $0x128] sm:$0xff]  ;;  %v73_v47 = vld [vmem:[%s2184_s1 + $0x120] sm:$0xff] }
  0x11   :  { %1010 = vmatpush3.msra.mxu1 %v78_v27  ;;  %976 = vmatprep.subr.mxu0 %v61_v28  ;;  %v56_v48 = vld [vmem:[%s2184_s1 + $0x98] sm:$0xff]  ;;  %v55_v52 = vld [vmem:[%s2184_s1 + $0x90] sm:$0xff]  ;;  %v54_v56 = vld [vmem:[%s2184_s1 + $0x88] sm:$0xff] }
  0x12   :  { %1011 = vmatprep.subr.mxu1 %v93_v29  ;;  %977 = vmatpush3.msra.mxu0 %v45_v30  ;;  %v88_v49 = vld [vmem:[%s2184_s1 + $0x198] sm:$0xff]  ;;  %v87_v53 = vld [vmem:[%s2184_s1 + $0x190] sm:$0xff]  ;;  %v86_v57 = vld [vmem:[%s2184_s1 + $0x188] sm:$0xff] }
  0x13   :  { %1012 = vmatpush3.msra.mxu1 %v77_v31  ;;  %978 = vmatprep.subr.mxu0 %v60_v32  ;;  %v40_v50 = vld [vmem:[%s2184_s1 + $0x18] sm:$0xff]  ;;  %v39_v54 = vld [vmem:[%s2184_s1 + $0x10] sm:$0xff]  ;;  %v38_v58 = vld [vmem:[%s2184_s1 + $0x8] sm:$0xff] }
  0x14   :  { %1013 = vmatprep.subr.mxu1 %v92_v33  ;;  %979 = vmatpush3.msra.mxu0 %v44_v34  ;;  %v72_v51 = vld [vmem:[%s2184_s1 + $0x118] sm:$0xff]  ;;  %v71_v55 = vld [vmem:[%s2184_s1 + $0x110] sm:$0xff]  ;;  %v70_v59 = vld [vmem:[%s2184_s1 + $0x108] sm:$0xff] }
  0x15   :  { %1014 = vmatpush3.msra.mxu1 %v76_v35  ;;  %980 = vmatprep.subr.mxu0 %v59_v36  ;;  %v53_v60 = vld [vmem:[%s2184_s1 + $0x80] sm:$0xff]  ;;  %v22_v63 = vld [vmem:[%s2183_s0 + $0x8] sm:$0xff]  ;;  %v24_v2 = vld [vmem:[%s2183_s0 + $0x18] sm:$0xff] }
  0x16   :  { %1015 = vmatprep.subr.mxu1 %v91_v37  ;;  %981 = vmatpush3.msra.mxu0 %v43_v38  ;;  %v85_v61 = vld [vmem:[%s2184_s1 + $0x180] sm:$0xff]  ;;  %v132_v3 = vld [vmem:[%s2184_s1 + $0x2f8] sm:$0xff]  ;;  %v23_v5 = vld [vmem:[%s2183_s0 + $0x10] sm:$0xff] }
  0x17   :  { %1016 = vmatpush3.msra.mxu1 %v75_v39  ;;  %982 = vmatprep.subr.mxu0 %v58_v40  ;;  %v37_v62 = vld [vmem:[%s2184_s1] sm:$0xff]  ;;  %v164_v4 = vld [vmem:[%s2184_s1 + $0x3f8] sm:$0xff]  ;;  %v131_v8 = vld [vmem:[%s2184_s1 + $0x2f0] sm:$0xff] }
  0x18   :  { %1017 = vmatprep.subr.mxu1 %v90_v41  ;;  %983 = vmatpush3.msra.mxu0 %v42_v42  ;;  %v69_v0 = vld [vmem:[%s2184_s1 + $0x100] sm:$0xff]  ;;  %v116_v6 = vld [vmem:[%s2184_s1 + $0x278] sm:$0xff]  ;;  %v163_v9 = vld [vmem:[%s2184_s1 + $0x3f0] sm:$0xff] }
  0x19   :  { %1018 = vmatpush3.msra.mxu1 %v74_v43  ;;  %984 = vmatprep.subr.mxu0 %v57_v44  ;;  %v21_v1 = vld [vmem:[%s2183_s0] sm:$0xff]  ;;  %v148_v7 = vld [vmem:[%s2184_s1 + $0x378] sm:$0xff]  ;;  %v115_v10 = vld [vmem:[%s2184_s1 + $0x270] sm:$0xff] }
  0x1a   :  { %1019 = vmatprep.subr.mxu1 %v89_v45  ;;  %985 = vmatpush3.msra.mxu0 %v41_v46  ;;  %v147_v11 = vld [vmem:[%s2184_s1 + $0x370] sm:$0xff]  ;;  %v130_v12 = vld [vmem:[%s2184_s1 + $0x2e8] sm:$0xff]  ;;  %v129_v16 = vld [vmem:[%s2184_s1 + $0x2e0] sm:$0xff] }
  0x1b   :  { %1020 = vmatpush3.msra.mxu1 %v73_v47  ;;  %986 = vmatprep.subr.mxu0 %v56_v48  ;;  %v162_v13 = vld [vmem:[%s2184_s1 + $0x3e8] sm:$0xff]  ;;  %v161_v17 = vld [vmem:[%s2184_s1 + $0x3e0] sm:$0xff]  ;;  %v128_v20 = vld [vmem:[%s2184_s1 + $0x2d8] sm:$0xff] }
  0x1c   :  { %1021 = vmatprep.subr.mxu1 %v88_v49  ;;  %987 = vmatpush3.msra.mxu0 %v40_v50  ;;  %v114_v14 = vld [vmem:[%s2184_s1 + $0x268] sm:$0xff]  ;;  %v113_v18 = vld [vmem:[%s2184_s1 + $0x260] sm:$0xff]  ;;  %v160_v21 = vld [vmem:[%s2184_s1 + $0x3d8] sm:$0xff] }
  0x1d   :  { %1022 = vmatpush3.msra.mxu1 %v72_v51  ;;  %988 = vmatprep.subr.mxu0 %v55_v52  ;;  %v146_v15 = vld [vmem:[%s2184_s1 + $0x368] sm:$0xff]  ;;  %v145_v19 = vld [vmem:[%s2184_s1 + $0x360] sm:$0xff]  ;;  %v112_v22 = vld [vmem:[%s2184_s1 + $0x258] sm:$0xff] }
  0x1e   :  { %1023 = vmatprep.subr.mxu1 %v87_v53  ;;  %989 = vmatpush3.msra.mxu0 %v39_v54  ;;  %v144_v23 = vld [vmem:[%s2184_s1 + $0x358] sm:$0xff]  ;;  %v127_v24 = vld [vmem:[%s2184_s1 + $0x2d0] sm:$0xff]  ;;  %v126_v28 = vld [vmem:[%s2184_s1 + $0x2c8] sm:$0xff] }
  0x1f   :  { %1024 = vmatpush3.msra.mxu1 %v71_v55  ;;  %990 = vmatprep.subr.mxu0 %v54_v56  ;;  %v159_v25 = vld [vmem:[%s2184_s1 + $0x3d0] sm:$0xff]  ;;  %v158_v29 = vld [vmem:[%s2184_s1 + $0x3c8] sm:$0xff]  ;;  %v125_v32 = vld [vmem:[%s2184_s1 + $0x2c0] sm:$0xff] }
  0x20   :  { %1025 = vmatprep.subr.mxu1 %v86_v57  ;;  %991 = vmatpush3.msra.mxu0 %v38_v58  ;;  %v111_v26 = vld [vmem:[%s2184_s1 + $0x250] sm:$0xff]  ;;  %v110_v30 = vld [vmem:[%s2184_s1 + $0x248] sm:$0xff]  ;;  %v157_v33 = vld [vmem:[%s2184_s1 + $0x3c0] sm:$0xff] }
  0x21   :  { %1026 = vmatpush3.msra.mxu1 %v70_v59  ;;  %992 = vmatprep.subr.mxu0 %v53_v60  ;;  %v143_v27 = vld [vmem:[%s2184_s1 + $0x350] sm:$0xff]  ;;  %v142_v31 = vld [vmem:[%s2184_s1 + $0x348] sm:$0xff]  ;;  %v109_v34 = vld [vmem:[%s2184_s1 + $0x240] sm:$0xff] }
  0x22   :  { %1027 = vmatprep.subr.mxu1 %v85_v61  ;;  %993 = vmatpush3.msra.mxu0 %v37_v62  ;;  %v141_v35 = vld [vmem:[%s2184_s1 + $0x340] sm:$0xff]  ;;  %v124_v36 = vld [vmem:[%s2184_s1 + $0x2b8] sm:$0xff]  ;;  %v123_v40 = vld [vmem:[%s2184_s1 + $0x2b0] sm:$0xff] }
  0x23   :  { %354 = vmatprep.mubr.f32.mxu0 %v22_v63  ;;  %1028 = vmatpush3.msra.mxu1 %v69_v0  ;;  %v156_v37 = vld [vmem:[%s2184_s1 + $0x3b8] sm:$0xff]  ;;  %v155_v41 = vld [vmem:[%s2184_s1 + $0x3b0] sm:$0xff]  ;;  %v122_v44 = vld [vmem:[%s2184_s1 + $0x2a8] sm:$0xff] }
  0x24   :  { %355 = vmatmul.mubr.f32.vlgmr.msra.gmra.mxu0 %v21_v1  ;;  %424 = vmatprep.mubr.f32.mxu1 %v24_v2  ;;  %v108_v38 = vld [vmem:[%s2184_s1 + $0x238] sm:$0xff]  ;;  %v107_v42 = vld [vmem:[%s2184_s1 + $0x230] sm:$0xff]  ;;  %v154_v45 = vld [vmem:[%s2184_s1 + $0x3a8] sm:$0xff] }
  0x25   :  { %1032 = vmatprep.subr.mxu0 %v132_v3  ;;  %1067 = vmatprep.subr.mxu1 %v164_v4  ;;  %v140_v39 = vld [vmem:[%s2184_s1 + $0x338] sm:$0xff]  ;;  %v139_v43 = vld [vmem:[%s2184_s1 + $0x330] sm:$0xff]  ;;  %v106_v46 = vld [vmem:[%s2184_s1 + $0x228] sm:$0xff] }
  0x26   :  { %425 = vmatmul.mubr.f32.vlgmr.msra.gmra.mxu1 %v23_v5  ;;  %1033 = vmatpush3.msra.mxu0 %v116_v6  ;;  %v138_v47 = vld [vmem:[%s2184_s1 + $0x328] sm:$0xff]  ;;  %v121_v48 = vld [vmem:[%s2184_s1 + $0x2a0] sm:$0xff]  ;;  %v120_v52 = vld [vmem:[%s2184_s1 + $0x298] sm:$0xff] }
  0x27   :  { %1068 = vmatpush3.msra.mxu1 %v148_v7  ;;  %1034 = vmatprep.subr.mxu0 %v131_v8  ;;  %v153_v49 = vld [vmem:[%s2184_s1 + $0x3a0] sm:$0xff]  ;;  %v152_v53 = vld [vmem:[%s2184_s1 + $0x398] sm:$0xff]  ;;  %v119_v56 = vld [vmem:[%s2184_s1 + $0x290] sm:$0xff] }
  0x28   :  { %1069 = vmatprep.subr.mxu1 %v163_v9  ;;  %1035 = vmatpush3.msra.mxu0 %v115_v10  ;;  %v105_v50 = vld [vmem:[%s2184_s1 + $0x220] sm:$0xff]  ;;  %v104_v54 = vld [vmem:[%s2184_s1 + $0x218] sm:$0xff]  ;;  %v151_v57 = vld [vmem:[%s2184_s1 + $0x390] sm:$0xff] }
  0x29   :  { %1070 = vmatpush3.msra.mxu1 %v147_v11  ;;  %1036 = vmatprep.subr.mxu0 %v130_v12  ;;  %v137_v51 = vld [vmem:[%s2184_s1 + $0x320] sm:$0xff]  ;;  %v136_v55 = vld [vmem:[%s2184_s1 + $0x318] sm:$0xff]  ;;  %v103_v58 = vld [vmem:[%s2184_s1 + $0x210] sm:$0xff] }
  0x2a   :  { %1071 = vmatprep.subr.mxu1 %v162_v13  ;;  %1037 = vmatpush3.msra.mxu0 %v114_v14  ;;  %v135_v59 = vld [vmem:[%s2184_s1 + $0x310] sm:$0xff]  ;;  %v118_v60 = vld [vmem:[%s2184_s1 + $0x288] sm:$0xff]  ;;  %v117_v0 = vld [vmem:[%s2184_s1 + $0x280] sm:$0xff] }
  0x2b   :  { %1072 = vmatpush3.msra.mxu1 %v146_v15  ;;  %1038 = vmatprep.subr.mxu0 %v129_v16  ;;  %v150_v61 = vld [vmem:[%s2184_s1 + $0x388] sm:$0xff]  ;;  %v149_v1 = vld [vmem:[%s2184_s1 + $0x380] sm:$0xff]  ;;  %v28_v6 = vld [vmem:[%s2183_s0 + $0x38] sm:$0xff] }
  0x2c   :  { %1073 = vmatprep.subr.mxu1 %v161_v17  ;;  %1039 = vmatpush3.msra.mxu0 %v113_v18  ;;  %v102_v62 = vld [vmem:[%s2184_s1 + $0x208] sm:$0xff]  ;;  %v101_v2 = vld [vmem:[%s2184_s1 + $0x200] sm:$0xff]  ;;  %v196_v7 = vld [vmem:[%s2184_s1 + $0x4f8] sm:$0xff] }
  0x2d   :  { %1074 = vmatpush3.msra.mxu1 %v145_v19  ;;  %1040 = vmatprep.subr.mxu0 %v128_v20  ;;  %v134_v63 = vld [vmem:[%s2184_s1 + $0x308] sm:$0xff]  ;;  %v133_v4 = vld [vmem:[%s2184_s1 + $0x300] sm:$0xff]  ;;  %v228_v8 = vld [vmem:[%s2184_s1 + $0x5f8] sm:$0xff] }
  0x2e   :  { %1075 = vmatprep.subr.mxu1 %v160_v21  ;;  %1041 = vmatpush3.msra.mxu0 %v112_v22  ;;  %v26_v3 = vld [vmem:[%s2183_s0 + $0x28] sm:$0xff]  ;;  %v25_v5 = vld [vmem:[%s2183_s0 + $0x20] sm:$0xff]  ;;  %v27_v9 = vld [vmem:[%s2183_s0 + $0x30] sm:$0xff] }
  0x2f   :  { %1076 = vmatpush3.msra.mxu1 %v144_v23  ;;  %1042 = vmatprep.subr.mxu0 %v127_v24  ;;  %v180_v10 = vld [vmem:[%s2184_s1 + $0x478] sm:$0xff]  ;;  %v195_v12 = vld [vmem:[%s2184_s1 + $0x4f0] sm:$0xff]  ;;  %v194_v16 = vld [vmem:[%s2184_s1 + $0x4e8] sm:$0xff] }
  0x30   :  { %1077 = vmatprep.subr.mxu1 %v159_v25  ;;  %1043 = vmatpush3.msra.mxu0 %v111_v26  ;;  %v212_v11 = vld [vmem:[%s2184_s1 + $0x578] sm:$0xff]  ;;  %v227_v13 = vld [vmem:[%s2184_s1 + $0x5f0] sm:$0xff]  ;;  %v226_v17 = vld [vmem:[%s2184_s1 + $0x5e8] sm:$0xff] }
  0x31   :  { %1078 = vmatpush3.msra.mxu1 %v143_v27  ;;  %1044 = vmatprep.subr.mxu0 %v126_v28  ;;  %v179_v14 = vld [vmem:[%s2184_s1 + $0x470] sm:$0xff]  ;;  %v178_v18 = vld [vmem:[%s2184_s1 + $0x468] sm:$0xff]  ;;  %v193_v20 = vld [vmem:[%s2184_s1 + $0x4e0] sm:$0xff] }
  0x32   :  { %1079 = vmatprep.subr.mxu1 %v158_v29  ;;  %1045 = vmatpush3.msra.mxu0 %v110_v30  ;;  %v211_v15 = vld [vmem:[%s2184_s1 + $0x570] sm:$0xff]  ;;  %v210_v19 = vld [vmem:[%s2184_s1 + $0x568] sm:$0xff]  ;;  %v225_v21 = vld [vmem:[%s2184_s1 + $0x5e0] sm:$0xff] }
  0x33   :  { %1080 = vmatpush3.msra.mxu1 %v142_v31  ;;  %1046 = vmatprep.subr.mxu0 %v125_v32  ;;  %v177_v22 = vld [vmem:[%s2184_s1 + $0x460] sm:$0xff]  ;;  %v192_v24 = vld [vmem:[%s2184_s1 + $0x4d8] sm:$0xff]  ;;  %v191_v28 = vld [vmem:[%s2184_s1 + $0x4d0] sm:$0xff] }
  0x34   :  { %1081 = vmatprep.subr.mxu1 %v157_v33  ;;  %1047 = vmatpush3.msra.mxu0 %v109_v34  ;;  %v209_v23 = vld [vmem:[%s2184_s1 + $0x560] sm:$0xff]  ;;  %v224_v25 = vld [vmem:[%s2184_s1 + $0x5d8] sm:$0xff]  ;;  %v223_v29 = vld [vmem:[%s2184_s1 + $0x5d0] sm:$0xff] }
  0x35   :  { %1082 = vmatpush3.msra.mxu1 %v141_v35  ;;  %1048 = vmatprep.subr.mxu0 %v124_v36  ;;  %v176_v26 = vld [vmem:[%s2184_s1 + $0x458] sm:$0xff]  ;;  %v175_v30 = vld [vmem:[%s2184_s1 + $0x450] sm:$0xff]  ;;  %v190_v32 = vld [vmem:[%s2184_s1 + $0x4c8] sm:$0xff] }
  0x36   :  { %1083 = vmatprep.subr.mxu1 %v156_v37  ;;  %1049 = vmatpush3.msra.mxu0 %v108_v38  ;;  %v208_v27 = vld [vmem:[%s2184_s1 + $0x558] sm:$0xff]  ;;  %v207_v31 = vld [vmem:[%s2184_s1 + $0x550] sm:$0xff]  ;;  %v222_v33 = vld [vmem:[%s2184_s1 + $0x5c8] sm:$0xff] }
  0x37   :  { %1084 = vmatpush3.msra.mxu1 %v140_v39  ;;  %1050 = vmatprep.subr.mxu0 %v123_v40  ;;  %v174_v34 = vld [vmem:[%s2184_s1 + $0x448] sm:$0xff]  ;;  %v189_v36 = vld [vmem:[%s2184_s1 + $0x4c0] sm:$0xff]  ;;  %v188_v40 = vld [vmem:[%s2184_s1 + $0x4b8] sm:$0xff] }
  0x38   :  { %1085 = vmatprep.subr.mxu1 %v155_v41  ;;  %1051 = vmatpush3.msra.mxu0 %v107_v42  ;;  %v206_v35 = vld [vmem:[%s2184_s1 + $0x548] sm:$0xff]  ;;  %v221_v37 = vld [vmem:[%s2184_s1 + $0x5c0] sm:$0xff]  ;;  %v220_v41 = vld [vmem:[%s2184_s1 + $0x5b8] sm:$0xff] }
  0x39   :  { %1086 = vmatpush3.msra.mxu1 %v139_v43  ;;  %1052 = vmatprep.subr.mxu0 %v122_v44  ;;  %v173_v38 = vld [vmem:[%s2184_s1 + $0x440] sm:$0xff]  ;;  %v172_v42 = vld [vmem:[%s2184_s1 + $0x438] sm:$0xff]  ;;  %v187_v44 = vld [vmem:[%s2184_s1 + $0x4b0] sm:$0xff] }
  0x3a   :  { %1087 = vmatprep.subr.mxu1 %v154_v45  ;;  %1053 = vmatpush3.msra.mxu0 %v106_v46  ;;  %v205_v39 = vld [vmem:[%s2184_s1 + $0x540] sm:$0xff]  ;;  %v204_v43 = vld [vmem:[%s2184_s1 + $0x538] sm:$0xff]  ;;  %v219_v45 = vld [vmem:[%s2184_s1 + $0x5b0] sm:$0xff] }
  0x3b   :  { %1088 = vmatpush3.msra.mxu1 %v138_v47  ;;  %1054 = vmatprep.subr.mxu0 %v121_v48  ;;  %v171_v46 = vld [vmem:[%s2184_s1 + $0x430] sm:$0xff]  ;;  %v186_v48 = vld [vmem:[%s2184_s1 + $0x4a8] sm:$0xff] }
  0x3c   :  { %1089 = vmatprep.subr.mxu1 %v153_v49  ;;  %1055 = vmatpush3.msra.mxu0 %v105_v50  ;;  %v203_v47 = vld [vmem:[%s2184_s1 + $0x530] sm:$0xff]  ;;  %v218_v49 = vld [vmem:[%s2184_s1 + $0x5a8] sm:$0xff] }
  0x3d   :  { %1090 = vmatpush3.msra.mxu1 %v137_v51  ;;  %1056 = vmatprep.subr.mxu0 %v120_v52 }
  0x3e   :  { %1091 = vmatprep.subr.mxu1 %v152_v53  ;;  %1057 = vmatpush3.msra.mxu0 %v104_v54 }
  0x3f   :  { %1092 = vmatpush3.msra.mxu1 %v136_v55  ;;  %1058 = vmatprep.subr.mxu0 %v119_v56 }
  0x40   :  { %1093 = vmatprep.subr.mxu1 %v151_v57  ;;  %1059 = vmatpush3.msra.mxu0 %v103_v58 }
  0x41   :  { %1094 = vmatpush3.msra.mxu1 %v135_v59  ;;  %1060 = vmatprep.subr.mxu0 %v118_v60 }
  0x42   :  { %1095 = vmatprep.subr.mxu1 %v150_v61  ;;  %1061 = vmatpush3.msra.mxu0 %v102_v62 }
  0x43   :  { %1096 = vmatpush3.msra.mxu1 %v134_v63  ;;  %1062 = vmatprep.subr.mxu0 %v117_v0 }
  0x44   :  { %1097 = vmatprep.subr.mxu1 %v149_v1  ;;  %1063 = vmatpush3.msra.mxu0 %v101_v2 }
  0x45   :  { %494 = vmatprep.mubr.f32.mxu0 %v26_v3  ;;  %1098 = vmatpush3.msra.mxu1 %v133_v4 }
  0x46   :  { %495 = vmatmul.mubr.f32.vlgmr.msra.gmra.mxu0 %v25_v5  ;;  %564 = vmatprep.mubr.f32.mxu1 %v28_v6 }
  0x47   :  { %1102 = vmatprep.subr.mxu0 %v196_v7  ;;  %1137 = vmatprep.subr.mxu1 %v228_v8 }
  0x48   :  { %565 = vmatmul.mubr.f32.vlgmr.msra.gmra.mxu1 %v27_v9  ;;  %1103 = vmatpush3.msra.mxu0 %v180_v10 }
  0x49   :  { %1138 = vmatpush3.msra.mxu1 %v212_v11  ;;  %1104 = vmatprep.subr.mxu0 %v195_v12 }
  0x4a   :  { %1139 = vmatprep.subr.mxu1 %v227_v13  ;;  %1105 = vmatpush3.msra.mxu0 %v179_v14 }
  0x4b   :  { %1140 = vmatpush3.msra.mxu1 %v211_v15  ;;  %1106 = vmatprep.subr.mxu0 %v194_v16 }
  0x4c   :  { %1141 = vmatprep.subr.mxu1 %v226_v17  ;;  %1107 = vmatpush3.msra.mxu0 %v178_v18 }
  0x4d   :  { %1142 = vmatpush3.msra.mxu1 %v210_v19  ;;  %1108 = vmatprep.subr.mxu0 %v193_v20 }
  0x4e   :  { %1143 = vmatprep.subr.mxu1 %v225_v21  ;;  %1109 = vmatpush3.msra.mxu0 %v177_v22 }
  0x4f   :  { %1144 = vmatpush3.msra.mxu1 %v209_v23  ;;  %1110 = vmatprep.subr.mxu0 %v192_v24 }
  0x50   :  { %1145 = vmatprep.subr.mxu1 %v224_v25  ;;  %1111 = vmatpush3.msra.mxu0 %v176_v26 }
  0x51   :  { %1146 = vmatpush3.msra.mxu1 %v208_v27  ;;  %1112 = vmatprep.subr.mxu0 %v191_v28 }
  0x52   :  { %1147 = vmatprep.subr.mxu1 %v223_v29  ;;  %1113 = vmatpush3.msra.mxu0 %v175_v30 }
  0x53   :  { %1148 = vmatpush3.msra.mxu1 %v207_v31  ;;  %1114 = vmatprep.subr.mxu0 %v190_v32 }
  0x54   :  { %1149 = vmatprep.subr.mxu1 %v222_v33  ;;  %1115 = vmatpush3.msra.mxu0 %v174_v34 }
  0x55   :  { %1150 = vmatpush3.msra.mxu1 %v206_v35  ;;  %1116 = vmatprep.subr.mxu0 %v189_v36 }
  0x56   :  { %1151 = vmatprep.subr.mxu1 %v221_v37  ;;  %1117 = vmatpush3.msra.mxu0 %v173_v38 }
  0x57   :  { %1152 = vmatpush3.msra.mxu1 %v205_v39  ;;  %1118 = vmatprep.subr.mxu0 %v188_v40 }
  0x58   :  { %1153 = vmatprep.subr.mxu1 %v220_v41  ;;  %1119 = vmatpush3.msra.mxu0 %v172_v42 }
  0x59   :  { %1154 = vmatpush3.msra.mxu1 %v204_v43 }
  0x5a   :  { %10 = vsyncpa [#allocation3], 0  ;;  %1120 = vmatprep.subr.mxu0 %v187_v44  ;;  %1155 = vmatprep.subr.mxu1 %v219_v45  ;;  %v170_v50 = vld [vmem:[%s2184_s1 + $0x428] sm:$0xff]  ;;  %v185_v52 = vld [vmem:[%s2184_s1 + $0x4a0] sm:$0xff]  ;;  %v1284_v16 = vmov 0.0   ;;  %vm286_vm0 = vcmask 130048  }
  0x5b   :  { %v202_v51 = vld [vmem:[%s2184_s1 + $0x528] sm:$0xff]  ;;  %1121 = vmatpush3.msra.mxu0 %v171_v46  ;;  %1156 = vmatpush3.msra.mxu1 %v203_v47  ;;  %v217_v53 = vld [vmem:[%s2184_s1 + $0x5a0] sm:$0xff]  ;;  %v184_v56 = vld [vmem:[%s2184_s1 + $0x498] sm:$0xff]  ;;  %vm1285_vm1 = vmmov 0   ;;  %s1286_s14 = smov [#allocation2]  }
  0x5c   :  { %1122 = vmatprep.subr.mxu0 %v186_v48  ;;  %1157 = vmatprep.subr.mxu1 %v218_v49  ;;  %v169_v54 = vld [vmem:[%s2184_s1 + $0x420] sm:$0xff]  ;;  %v216_v57 = vld [vmem:[%s2184_s1 + $0x598] sm:$0xff]  ;;  %v183_v60 = vld [vmem:[%s2184_s1 + $0x490] sm:$0xff]  ;;  %s951_s15 = sshll.u32 %s1286_s14, 4  ;;  %s952_s15 = int_to_ptr.vmem [resolvable:$true] %s951_s15 }
  0x5d   :  { %v201_v55 = vld [vmem:[%s2184_s1 + $0x520] sm:$0xff]  ;;  %1123 = vmatpush3.msra.mxu0 %v170_v50  ;;  %1158 = vmatpush3.msra.mxu1 %v202_v51  ;;  %v168_v58 = vld [vmem:[%s2184_s1 + $0x418] sm:$0xff]  ;;  %v215_v61 = vld [vmem:[%s2184_s1 + $0x590] sm:$0xff]  ;;  %s1262_s16 = scalar_lea.vmem %s952_s15, 128  ;;  %p1267_p1 = scmp.lt.s32.totalorder %s952_s15, %s952_s15 }
  0x5e   :  { %1124 = vmatprep.subr.mxu0 %v185_v52  ;;  %1159 = vmatprep.subr.mxu1 %v217_v53  ;;  %v200_v59 = vld [vmem:[%s2184_s1 + $0x518] sm:$0xff]  ;;  %v167_v62 = vld [vmem:[%s2184_s1 + $0x410] sm:$0xff]  ;;  %v182_v0 = vld [vmem:[%s2184_s1 + $0x488] sm:$0xff]  ;;  %p1263_p0 = scmp.ne.s32.totalorder %s952_s15, %s1262_s16  ;;  %p1268_p2 = scmp.lt.s32.totalorder %s1262_s16, %s1262_s16 }
  0x5f   :  { %1125 = vmatpush3.msra.mxu0 %v169_v54  ;;  %1160 = vmatpush3.msra.mxu1 %v201_v55  ;;  %v199_v63 = vld [vmem:[%s2184_s1 + $0x510] sm:$0xff]  ;;  %v214_v1 = vld [vmem:[%s2184_s1 + $0x588] sm:$0xff]  ;;  %v181_v4 = vld [vmem:[%s2184_s1 + $0x480] sm:$0xff] }
  0x60   :  { %1126 = vmatprep.subr.mxu0 %v184_v56  ;;  %1161 = vmatprep.subr.mxu1 %v216_v57  ;;  %v166_v2 = vld [vmem:[%s2184_s1 + $0x408] sm:$0xff]  ;;  %v213_v5 = vld [vmem:[%s2184_s1 + $0x580] sm:$0xff]  ;;  %v32_v10 = vld [vmem:[%s2183_s0 + $0x58] sm:$0xff]  ;;  %p1269_p3 = por %p1268_p2, %p1267_p1 }
  0x61   :  { %1127 = vmatpush3.msra.mxu0 %v168_v58  ;;  %1162 = vmatpush3.msra.mxu1 %v200_v59  ;;  %v198_v3 = vld [vmem:[%s2184_s1 + $0x508] sm:$0xff]  ;;  %v165_v6 = vld [vmem:[%s2184_s1 + $0x400] sm:$0xff]  ;;  %v260_v11 = vld [vmem:[%s2184_s1 + $0x6f8] sm:$0xff] }
  0x62   :  { %1128 = vmatprep.subr.mxu0 %v183_v60  ;;  %1163 = vmatprep.subr.mxu1 %v215_v61  ;;  %v30_v7 = vld [vmem:[%s2183_s0 + $0x48] sm:$0xff]  ;;  %v197_v8 = vld [vmem:[%s2184_s1 + $0x500] sm:$0xff]  ;;  %v31_v12 = vld [vmem:[%s2183_s0 + $0x50] sm:$0xff]  ;;  %p1270_p4 = pnand %p1269_p3, %p1263_p0 }
  0x63   :  { %1129 = vmatpush3.msra.mxu0 %v167_v62  ;;  %1164 = vmatpush3.msra.mxu1 %v199_v63  ;;  %v29_v9 = vld [vmem:[%s2183_s0 + $0x40] sm:$0xff]  ;;  %v244_v13 = vld [vmem:[%s2184_s1 + $0x678] sm:$0xff]  ;;  %v259_v15 = vld [vmem:[%s2184_s1 + $0x6f0] sm:$0xff] }
  0x64   :  { %1130 = vmatprep.subr.mxu0 %v182_v0  ;;  %1165 = vmatprep.subr.mxu1 %v214_v1  ;;  %v276_v14 = vld [vmem:[%s2184_s1 + $0x778] sm:$0xff]  ;;  %v243_v17 = vld [vmem:[%s2184_s1 + $0x670] sm:$0xff]  ;;  %v258_v19 = vld [vmem:[%s2184_s1 + $0x6e8] sm:$0xff] }
  0x65   :  { %1131 = vmatpush3.msra.mxu0 %v166_v2  ;;  %1166 = vmatpush3.msra.mxu1 %v198_v3  ;;  %v275_v18 = vld [vmem:[%s2184_s1 + $0x770] sm:$0xff]  ;;  %v242_v20 = vld [vmem:[%s2184_s1 + $0x668] sm:$0xff]  ;;  %v257_v22 = vld [vmem:[%s2184_s1 + $0x6e0] sm:$0xff] }
  0x66   :  { %1132 = vmatprep.subr.mxu0 %v181_v4  ;;  %1167 = vmatprep.subr.mxu1 %v213_v5  ;;  %v274_v21 = vld [vmem:[%s2184_s1 + $0x768] sm:$0xff]  ;;  %v241_v23 = vld [vmem:[%s2184_s1 + $0x660] sm:$0xff]  ;;  %v256_v25 = vld [vmem:[%s2184_s1 + $0x6d8] sm:$0xff] }
  0x67   :  { %1133 = vmatpush3.msra.mxu0 %v165_v6  ;;  %634 = vmatprep.mubr.f32.mxu0 %v30_v7  ;;  %v273_v24 = vld [vmem:[%s2184_s1 + $0x760] sm:$0xff]  ;;  %v240_v26 = vld [vmem:[%s2184_s1 + $0x658] sm:$0xff]  ;;  %v255_v28 = vld [vmem:[%s2184_s1 + $0x6d0] sm:$0xff] }
  0x68   :  { %1168 = vmatpush3.msra.mxu1 %v197_v8  ;;  %635 = vmatmul.mubr.f32.vlgmr.msra.gmra.mxu0 %v29_v9  ;;  %v272_v27 = vld [vmem:[%s2184_s1 + $0x758] sm:$0xff]  ;;  %v239_v29 = vld [vmem:[%s2184_s1 + $0x650] sm:$0xff]  ;;  %v254_v31 = vld [vmem:[%s2184_s1 + $0x6c8] sm:$0xff] }
  0x69   :  { %704 = vmatprep.mubr.f32.mxu1 %v32_v10  ;;  %1172 = vmatprep.subr.mxu0 %v260_v11  ;;  %v271_v30 = vld [vmem:[%s2184_s1 + $0x750] sm:$0xff]  ;;  %v238_v32 = vld [vmem:[%s2184_s1 + $0x648] sm:$0xff]  ;;  %v253_v34 = vld [vmem:[%s2184_s1 + $0x6c0] sm:$0xff] }
  0x6a   :  { %780 = vmatprep.subr.mxu1 %v1284_v16  ;;  %705 = vmatmul.mubr.f32.vlgmr.msra.gmra.mxu1 %v31_v12  ;;  %v270_v33 = vld [vmem:[%s2184_s1 + $0x748] sm:$0xff]  ;;  %v237_v35 = vld [vmem:[%s2184_s1 + $0x640] sm:$0xff]  ;;  %v252_v37 = vld [vmem:[%s2184_s1 + $0x6b8] sm:$0xff] }
  0x6b   :  { %1173 = vmatpush3.msra.mxu0 %v244_v13  ;;  %781 = vmatpush1.msra.mxu1 %v276_v14  ;;  %v269_v36 = vld [vmem:[%s2184_s1 + $0x740] sm:$0xff]  ;;  %v236_v38 = vld [vmem:[%s2184_s1 + $0x638] sm:$0xff]  ;;  %v251_v40 = vld [vmem:[%s2184_s1 + $0x6b0] sm:$0xff] }
  0x6c   :  { %1174 = vmatprep.subr.mxu0 %v259_v15  ;;  %782 = vmatprep.subr.mxu1 %v1284_v16  ;;  %v268_v39 = vld [vmem:[%s2184_s1 + $0x738] sm:$0xff]  ;;  %v235_v41 = vld [vmem:[%s2184_s1 + $0x630] sm:$0xff]  ;;  %v250_v43 = vld [vmem:[%s2184_s1 + $0x6a8] sm:$0xff] }
  0x6d   :  { %1175 = vmatpush3.msra.mxu0 %v243_v17  ;;  %783 = vmatpush1.msra.mxu1 %v275_v18  ;;  %v267_v42 = vld [vmem:[%s2184_s1 + $0x730] sm:$0xff]  ;;  %v234_v44 = vld [vmem:[%s2184_s1 + $0x628] sm:$0xff]  ;;  %v249_v46 = vld [vmem:[%s2184_s1 + $0x6a0] sm:$0xff] }
  0x6e   :  { %1176 = vmatprep.subr.mxu0 %v258_v19  ;;  %784 = vmatprep.subr.mxu1 %v1284_v16  ;;  %v266_v45 = vld [vmem:[%s2184_s1 + $0x728] sm:$0xff]  ;;  %v233_v47 = vld [vmem:[%s2184_s1 + $0x620] sm:$0xff]  ;;  %v248_v49 = vld [vmem:[%s2184_s1 + $0x698] sm:$0xff] }
  0x6f   :  { %1177 = vmatpush3.msra.mxu0 %v242_v20  ;;  %785 = vmatpush1.msra.mxu1 %v274_v21  ;;  %v265_v48 = vld [vmem:[%s2184_s1 + $0x720] sm:$0xff]  ;;  %v232_v50 = vld [vmem:[%s2184_s1 + $0x618] sm:$0xff]  ;;  %v247_v52 = vld [vmem:[%s2184_s1 + $0x690] sm:$0xff] }
  0x70   :  { %1178 = vmatprep.subr.mxu0 %v257_v22  ;;  %786 = vmatprep.subr.mxu1 %v1284_v16  ;;  %v264_v51 = vld [vmem:[%s2184_s1 + $0x718] sm:$0xff]  ;;  %v231_v53 = vld [vmem:[%s2184_s1 + $0x610] sm:$0xff]  ;;  %v246_v55 = vld [vmem:[%s2184_s1 + $0x688] sm:$0xff] }
  0x71   :  { %1179 = vmatpush3.msra.mxu0 %v241_v23  ;;  %787 = vmatpush1.msra.mxu1 %v273_v24  ;;  %v263_v54 = vld [vmem:[%s2184_s1 + $0x710] sm:$0xff]  ;;  %v230_v56 = vld [vmem:[%s2184_s1 + $0x608] sm:$0xff]  ;;  %v245_v58 = vld [vmem:[%s2184_s1 + $0x680] sm:$0xff] }
  0x72   :  { %1180 = vmatprep.subr.mxu0 %v256_v25  ;;  %788 = vmatprep.subr.mxu1 %v1284_v16  ;;  %v262_v57 = vld [vmem:[%s2184_s1 + $0x708] sm:$0xff]  ;;  %v229_v59 = vld [vmem:[%s2184_s1 + $0x600] sm:$0xff]  ;;  %v36_v63 = vld [vmem:[%s2183_s0 + $0x78] sm:$0xff] }
  0x73   :  { %1181 = vmatpush3.msra.mxu0 %v240_v26  ;;  %789 = vmatpush1.msra.mxu1 %v272_v27  ;;  %v34_v60 = vld [vmem:[%s2183_s0 + $0x68] sm:$0xff]  ;;  %v261_v61 = vld [vmem:[%s2184_s1 + $0x700] sm:$0xff]  ;;  %v35_v2 = vld [vmem:[%s2183_s0 + $0x70] sm:$0xff] }
  0x74   :  { %1182 = vmatprep.subr.mxu0 %v255_v28  ;;  %790 = vmatprep.subr.mxu1 %v1284_v16  ;;  %v33_v62 = vld [vmem:[%s2183_s0 + $0x60] sm:$0xff]  ;;  %v278_v0 = vld [vmem:[%s2184_s1 + $0x788] sm:$0xff]  ;;  %v866_v3 = vld [vmem:[%s2186_s3 + $0x78] sm:$0xff] }
  0x75   :  { %1183 = vmatpush3.msra.mxu0 %v239_v29  ;;  %791 = vmatpush1.msra.mxu1 %v271_v30  ;;  %v277_v1 = vld [vmem:[%s2184_s1 + $0x780] sm:$0xff]  ;;  %v865_v4 = vld [vmem:[%s2186_s3 + $0x70] sm:$0xff]  ;;  %v864_v5 = vld [vmem:[%s2186_s3 + $0x68] sm:$0xff] }
  0x76   :  { %1184 = vmatprep.subr.mxu0 %v254_v31  ;;  %792 = vmatprep.subr.mxu1 %v1284_v16  ;;  %v863_v6 = vld [vmem:[%s2186_s3 + $0x60] sm:$0xff]  ;;  %v862_v7 = vld [vmem:[%s2186_s3 + $0x58] sm:$0xff]  ;;  %v861_v8 = vld [vmem:[%s2186_s3 + $0x50] sm:$0xff] }
  0x77   :  { %1185 = vmatpush3.msra.mxu0 %v238_v32  ;;  %793 = vmatpush1.msra.mxu1 %v270_v33  ;;  %v860_v9 = vld [vmem:[%s2186_s3 + $0x48] sm:$0xff]  ;;  %v859_v10 = vld [vmem:[%s2186_s3 + $0x40] sm:$0xff]  ;;  %v858_v11 = vld [vmem:[%s2186_s3 + $0x38] sm:$0xff] }
  0x78   :  { %1186 = vmatprep.subr.mxu0 %v253_v34  ;;  %794 = vmatprep.subr.mxu1 %v1284_v16  ;;  %v857_v12 = vld [vmem:[%s2186_s3 + $0x30] sm:$0xff]  ;;  %v856_v13 = vld [vmem:[%s2186_s3 + $0x28] sm:$0xff]  ;;  %v855_v14 = vld [vmem:[%s2186_s3 + $0x20] sm:$0xff] }
  0x79   :  { %1187 = vmatpush3.msra.mxu0 %v237_v35  ;;  %795 = vmatpush1.msra.mxu1 %v269_v36  ;;  %v854_v15 = vld [vmem:[%s2186_s3 + $0x18] sm:$0xff]  ;;  %v853_v17 = vld [vmem:[%s2186_s3 + $0x10] sm:$0xff]  ;;  %v852_v18 = vld [vmem:[%s2186_s3 + $0x8] sm:$0xff] }
  0x7a   :  { %1188 = vmatprep.subr.mxu0 %v252_v37  ;;  %796 = vmatprep.subr.mxu1 %v1284_v16  ;;  %v851_v19 = vld [vmem:[%s2186_s3] sm:$0xff] }
  0x7b   :  { %1189 = vmatpush3.msra.mxu0 %v236_v38  ;;  %797 = vmatpush1.msra.mxu1 %v268_v39  ;;  %v959_v25 = vld [vmem:[%s2185_s2] ss:$0 sm:$0xff] }
  0x7c   :  { %1190 = vmatprep.subr.mxu0 %v251_v40  ;;  %798 = vmatprep.subr.mxu1 %v1284_v16 }
  0x7d   :  { %1191 = vmatpush3.msra.mxu0 %v235_v41  ;;  %799 = vmatpush1.msra.mxu1 %v267_v42 }
  0x7e   :  { %1192 = vmatprep.subr.mxu0 %v250_v43  ;;  %800 = vmatprep.subr.mxu1 %v1284_v16 }
  0x7f   :  { %1193 = vmatpush3.msra.mxu0 %v234_v44  ;;  %801 = vmatpush1.msra.mxu1 %v266_v45 }
  0x80   :  { %1194 = vmatprep.subr.mxu0 %v249_v46  ;;  %802 = vmatprep.subr.mxu1 %v1284_v16 }
  0x81   :  { %1195 = vmatpush3.msra.mxu0 %v233_v47  ;;  %803 = vmatpush1.msra.mxu1 %v265_v48 }
  0x82   :  { %1196 = vmatprep.subr.mxu0 %v248_v49  ;;  %804 = vmatprep.subr.mxu1 %v1284_v16 }
  0x83   :  { %1197 = vmatpush3.msra.mxu0 %v232_v50  ;;  %805 = vmatpush1.msra.mxu1 %v264_v51 }
  0x84   :  { %1198 = vmatprep.subr.mxu0 %v247_v52  ;;  %806 = vmatprep.subr.mxu1 %v1284_v16  ;;  %v961_v52 = vld [vmem:[%s2187_s4] ss:$0 sm:$0xff] }
  0x85   :  { %1199 = vmatpush3.msra.mxu0 %v231_v53  ;;  %807 = vmatpush1.msra.mxu1 %v263_v54 }
  0x86   :  { %1200 = vmatprep.subr.mxu0 %v246_v55  ;;  %808 = vmatprep.subr.mxu1 %v1284_v16 }
  0x87   :  { %1201 = vmatpush3.msra.mxu0 %v230_v56  ;;  %809 = vmatpush1.msra.mxu1 %v262_v57 }
  0x88   :  { %1202 = vmatprep.subr.mxu0 %v245_v58  ;;  %810 = vmatprep.subr.mxu1 %v1284_v16 }
  0x89   :  { %1203 = vmatpush3.msra.mxu0 %v229_v59  ;;  %774 = vmatprep.mubr.f32.mxu0 %v34_v60 }
  0x8a   :  { %811 = vmatpush1.msra.mxu1 %v261_v61  ;;  %775 = vmatmul.mubr.f32.vlgmr.msra.gmra.mxu0 %v33_v62 }
  0x8b   :  { %840 = vmatprep.subr.mxu1 %v1284_v16  ;;  %960 = vmatprep.mubr.msk.f32.mxu1 %vm286_vm0, %v36_v63 }
  0x8c   :  { %841 = vmatpush2.msra.mxu1 %v278_v0  ;;  %1224 = vmatprep.subr.mxu0 %v1284_v16 }
  0x8d   :  { %842 = vmatprep.subr.mxu1 %v1284_v16  ;;  %1225 = vmatpush3.msra.mxu0 %v866_v3 }
  0x8e   :  { %843 = vmatpush2.msra.mxu1 %v277_v1  ;;  %1226 = vmatprep.subr.mxu0 %v1284_v16 }
  0x8f   :  { %845 = vmatmul.mubr.f32.vlgmr.msra.gmra.mxu1 %v35_v2  ;;  %1227 = vmatpush3.msra.mxu0 %v865_v4 }
  0x90   :  { %1228 = vmatprep.subr.mxu0 %v1284_v16  ;;  %1256 = vmatprep.mubr.msk.f32.mxu0 %vm1285_vm1, %v1284_v16 }
  0x91   :  { %1229 = vmatpush3.msra.mxu0 %v864_v5 }
  0x92   :  { %1230 = vmatprep.subr.mxu0 %v1284_v16 }
  0x93   :  { %1231 = vmatpush3.msra.mxu0 %v863_v6 }
  0x94   :  { %1232 = vmatprep.subr.mxu0 %v1284_v16 }
  0x95   :  { %1233 = vmatpush3.msra.mxu0 %v862_v7 }
  0x96   :  { %1234 = vmatprep.subr.mxu0 %v1284_v16 }
  0x97   :  { %1235 = vmatpush3.msra.mxu0 %v861_v8 }
  0x98   :  { %1236 = vmatprep.subr.mxu0 %v1284_v16 }
  0x99   :  { %1237 = vmatpush3.msra.mxu0 %v860_v9 }
  0x9a   :  { %1238 = vmatprep.subr.mxu0 %v1284_v16 }
  0x9b   :  { %1239 = vmatpush3.msra.mxu0 %v859_v10 }
  0x9c   :  { %1240 = vmatprep.subr.mxu0 %v1284_v16 }
  0x9d   :  { %1241 = vmatpush3.msra.mxu0 %v858_v11 }
  0x9e   :  { %1242 = vmatprep.subr.mxu0 %v1284_v16 }
  0x9f   :  { %1243 = vmatpush3.msra.mxu0 %v857_v12 }
  0xa0   :  { %1244 = vmatprep.subr.mxu0 %v1284_v16 }
  0xa1   :  { %1245 = vmatpush3.msra.mxu0 %v856_v13 }
  0xa2   :  { %1246 = vmatprep.subr.mxu0 %v1284_v16 }
  0xa3   :  { %1247 = vmatpush3.msra.mxu0 %v855_v14 }
  0xa4   :  { %1248 = vmatprep.subr.mxu0 %v1284_v16 }
  0xa5   :  { %1249 = vmatpush3.msra.mxu0 %v854_v15 }
  0xa6   :  { %1250 = vmatprep.subr.mxu0 %v1284_v16 }
  0xa7   :  { %1251 = vmatpush3.msra.mxu0 %v853_v17 }
  0xa8   :  { %1252 = vmatprep.subr.mxu0 %v1284_v16 }
  0xa9   :  { %1253 = vmatpush3.msra.mxu0 %v852_v18 }
  0xaa   :  { %1254 = vmatprep.subr.mxu0 %v1284_v16 }
  0xab   :  { %1255 = vmatpush3.msra.mxu0 %v851_v19 }
  0xe4   :  { %v994_v20 = vpop.f32.mrf.mxu0 }
  0xe6   :  { %v1029_v21 = vpop.f32.mrf.mxu1  ;;  %v995_v22 = vpop.f32.mrf.mxu0 }
  0xe7   :  { %v996_v24 = vadd.f32 %v995_v22, %v994_v20 }
  0xe8   :  { %v1030_v26 = vpop.f32.mrf.mxu1 }
  0xe9   :  { %v357_v29 = vadd.f32 %v996_v24, %v959_v25  ;;  %v1031_v30 = vadd.f32 %v1030_v26, %v1029_v21 }
  0xeb   :  { %v427_v34 = vadd.f32 %v1031_v30, %v357_v29 }
 0x106   :  { %v1064_v23 = vpop.f32.mrf.mxu0 }
 0x108   :  { %v1099_v27 = vpop.f32.mrf.mxu1  ;;  %v1065_v28 = vpop.f32.mrf.mxu0 }
 0x109   :  { %v1066_v32 = vadd.f32 %v1065_v28, %v1064_v23 }
 0x10a   :  { %v1100_v33 = vpop.f32.mrf.mxu1 }
 0x10b   :  { %v497_v36 = vadd.f32 %v1066_v32, %v427_v34  ;;  %v1101_v37 = vadd.f32 %v1100_v33, %v1099_v27 }
 0x10d   :  { %v567_v40 = vadd.f32 %v1101_v37, %v497_v36 }
 0x128   :  { %v1134_v31 = vpop.f32.mrf.mxu0 }
 0x12a   :  { %v1169_v16 = vpop.f32.mrf.mxu1  ;;  %v1135_v35 = vpop.f32.mrf.mxu0 }
 0x12b   :  { %v1136_v38 = vadd.f32 %v1135_v35, %v1134_v31 }
 0x12c   :  { %v1170_v39 = vpop.f32.mrf.mxu1 }
 0x12d   :  { %v637_v41 = vadd.f32 %v1136_v38, %v567_v40  ;;  %v1171_v42 = vadd.f32 %v1170_v39, %v1169_v16 }
 0x12f   :  { %v707_v45 = vadd.f32 %v1171_v42, %v637_v41 }
 0x14a   :  { %v1204_v43 = vpop.f32.mrf.mxu0 }
 0x14c   :  { %v1205_v44 = vpop.f32.mrf.mxu0 }
 0x14d   :  { %v1206_v46 = vadd.f32 %v1205_v44, %v1204_v43 }
 0x14f   :  { %v777_v47 = vadd.f32 %v1206_v46, %v707_v45  ;;  %v846_v48 = vpop.f32.mrf.mxu1 }
 0x151   :  { %v847_v49 = vadd.f32 %v846_v48, %v777_v47  ;;  %v848_v50 = vpop.f32.mrf.mxu1 }
 0x153   :  { %v850_v51 = vmax.f32 %v847_v49, 0.0 }
 0x155   :  { %1257 = vmatmul.mubr.f32.vlgmr.msra.gmra.mxu0 %v850_v51 }
 0x215   :  { %v940_v53 = vpop.f32.mrf.mxu0 }
 0x216   :  { %v941_v54 = vadd.f32 %v961_v52, %v940_v53 }
 0x217   :  { %v1258_v55 = vpop.f32.mrf.mxu0 }
 0x218   :  { %944 = vst [vmem:[#allocation2] sm:$0xff] %v941_v54 }
 0x219   :  { %1273 = shalt.err (!%p1270_p4)
}
 0x21a   :  { %954 = dma.vmem_to_hbm [thread:$0]  %s952_s15, 128, %s2188_s5, [#allocation3]  }
 0x21b   :  { %1282 = dma.done.wait [#allocation3], 128  }
 0x21c   :  { %1283 = vsyncadd [#allocation3], 4294967168 }
 0x21d   :  { %958 = vsyncpa [#allocation3], 1 }

</bundles_post_ra>
